<compile_context>
chip_gen: v7x
topology: tpu7x:2x2x1
jax: 0.10.0
libtpu: 0.0.40
codegen_flags: <defaults>
</compile_context>

<pallas_src>
from collections import OrderedDict

import numpy as np
import jax
import jax.numpy as jnp
from jax.experimental import pallas as pl
from jax.experimental.pallas import tpu as pltpu


def _round_up(x, m):
    return ((x + m - 1) // m) * m


# --------------------------------------------------------------------------
# Kernels
# --------------------------------------------------------------------------
def _decoder_kernel_single(feats_ref, w_ref, b_ref, out_ref):
    """Fast path (grid_k == 1): out[:, jTN:(j+1)TN] = feats @ W_tile + b_tile."""
    a = feats_ref[...]
    if a.dtype != w_ref.dtype:            # static trace-time check (bf16 weights)
        a = a.astype(w_ref.dtype)
    out_ref[...] = (
        jnp.dot(a, w_ref[...], preferred_element_type=jnp.float32) + b_ref[...]
    ).astype(out_ref.dtype)


def _make_decoder_kernel_acc(tk):
    """General path: grid = (N tiles, K tiles); K is the reduction axis (last).

    feats stays resident in VMEM (constant index_map) and is sliced in-kernel.
    """

    def kernel(feats_ref, w_ref, b_ref, out_ref, acc_ref):
        k = pl.program_id(1)

        @pl.when(k == 0)
        def _():
            acc_ref[...] = jnp.zeros_like(acc_ref)

        start = pl.multiple_of(k * tk, tk)
        a = feats_ref[:, pl.ds(start, tk)]
        if a.dtype != w_ref.dtype:
            a = a.astype(w_ref.dtype)
        acc_ref[...] += jnp.dot(a, w_ref[...], preferred_element_type=jnp.float32)

        @pl.when(k == pl.num_programs(1) - 1)
        def _():
            out_ref[...] = (acc_ref[...] + b_ref[...]).astype(out_ref.dtype)

    return kernel


# --------------------------------------------------------------------------
# Parameter preparation (hoisted out of the forward path)
# --------------------------------------------------------------------------
def prepare_decoder_params(weights, biases, obs_shapes, *, tn=None, tk=None,
                           param_dtype=jnp.float32):
    """Fuse per-modality Linear heads into one padded weight/bias ONCE.

    Returns (w_cat [d_pad, n_pad] param_dtype, b_cat [1, n_pad] f32, meta).
    For real (large) decoder heads pass param_dtype=jnp.bfloat16 to halve the
    HBM weight traffic (f32 accumulation is kept in the kernel).
    """
    keys = list(obs_shapes.keys())
    out_dims = [int(np.prod(obs_shapes[k])) for k in keys]
    n_total = int(sum(out_dims))
    D = int(weights[keys[0]].shape[0])
    w_itemsize = jnp.dtype(param_dtype).itemsize

    # Default tiles sized for the weight stream (the dominant HBM traffic):
    # ~4 MiB per weight buffer for f32, ~8 MiB for bf16/narrower.
    if tk is None:
        tk = 1024 if w_itemsize >= 4 else 2048
    if tn is None:
        tn = 1024 if w_itemsize >= 4 else 2048

    # --- reduction (K) axis: pad D to 128 and tile only when it is large ---
    d_128 = _round_up(D, 128)
    tk_eff = _round_up(min(int(tk), d_128), 128)
    d_pad = _round_up(d_128, tk_eff)

    # --- output (N) axis: lane-dense, multiple of 128 ---
    n_128 = _round_up(max(n_total, 128), 128)
    tn_eff = min(_round_up(int(tn), 128), n_128)
    # Guarantee >= 2 N tiles when possible so v7x's second TensorCore has work.
    if tn_eff >= n_128 and n_128 % 256 == 0:
        tn_eff = n_128 // 2
    n_pad = _round_up(n_128, tn_eff)

    w_cat = jnp.concatenate([jnp.asarray(weights[k]) for k in keys], axis=1)  # [D, N]
    b_cat = jnp.concatenate([jnp.asarray(biases[k]) for k in keys], axis=0)   # [N]
    w_cat = jnp.pad(w_cat, ((0, d_pad - D), (0, n_pad - n_total))).astype(param_dtype)
    b_cat = jnp.pad(b_cat, (0, n_pad - n_total)).reshape(1, n_pad).astype(jnp.float32)

    meta = dict(keys=keys, out_dims=out_dims, n_total=n_total, n_pad=n_pad,
                d=D, d_pad=d_pad, tn=tn_eff, tk=tk_eff)
    return w_cat, b_cat, meta


# --------------------------------------------------------------------------
# Forward
# --------------------------------------------------------------------------
def observation_decoder_forward(feats, w_cat, b_cat, obs_shapes, meta):
    """
    Args:
      feats:      [B, D] flat input features.
      w_cat:      [d_pad, n_pad] fused, padded weight (prepare_decoder_params).
      b_cat:      [1, n_pad] fused, padded bias (f32).
      obs_shapes: OrderedDict k -> output shape tuple (without batch dim).
      meta:       dict from prepare_decoder_params.
    Returns:
      OrderedDict k -> [B, *obs_shapes[k]] predictions (feats.dtype).
    """
    B, D = feats.shape
    assert D == meta["d"], "feats feature dim does not match prepared params"
    tn, tk = meta["tn"], meta["tk"]
    n_pad, d_pad = meta["n_pad"], meta["d_pad"]

    f_itemsize = jnp.dtype(feats.dtype).itemsize
    sub = 8 if f_itemsize >= 4 else 16           # sublane multiple
    B_pad = _round_up(B, sub)

    feats_in = feats
    if (B_pad, d_pad) != (B, D):
        feats_in = jnp.pad(feats, ((0, B_pad - B), (0, d_pad - D)))

    grid_n = n_pad // tn
    grid_k = d_pad // tk
    w_itemsize = jnp.dtype(w_cat.dtype).itemsize

    # Advisory cost estimate (weight stream dominates traffic).
    cost = pl.CostEstimate(
        flops=2 * B_pad * d_pad * n_pad,
        transcendentals=0,
        bytes_accessed=(d_pad * n_pad * w_itemsize
                        + B_pad * d_pad * f_itemsize
                        + n_pad * 4
                        + B_pad * n_pad * f_itemsize),
    )

    if grid_k == 1:
        kernel = _decoder_kernel_single
        grid = (grid_n,)
        in_specs = [
            # feats resident across all N tiles.
            pl.BlockSpec((B_pad, d_pad), lambda j: (0, 0)),
            # weight tile: the streamed, bandwidth-dominant input.
            pl.BlockSpec((d_pad, tn), lambda j: (0, j)),
            # bias tile.
            pl.BlockSpec((1, tn), lambda j: (0, j)),
        ]
        out_specs = pl.BlockSpec((B_pad, tn), lambda j: (0, j))
        scratch_shapes = []
        dim_sem = ("parallel",)
        w_tile_k = d_pad
    else:
        kernel = _make_decoder_kernel_acc(tk)
        grid = (grid_n, grid_k)
        in_specs = [
            # feats resident across the whole grid (sliced in-kernel by K).
            pl.BlockSpec((B_pad, d_pad), lambda j, k: (0, 0)),
            pl.BlockSpec((tk, tn), lambda j, k: (k, j)),
            # bias index_map ignores k -> fetched once per N tile.
            pl.BlockSpec((1, tn), lambda j, k: (0, j)),
        ]
        out_specs = pl.BlockSpec((B_pad, tn), lambda j, k: (0, j))
        scratch_shapes = [pltpu.VMEM((B_pad, tn), jnp.float32)]
        dim_sem = ("parallel", "arbitrary")
        w_tile_k = tk

    # Explicit scoped-VMEM budget: enough for double-buffered tiles with 2x
    # headroom, floored at 32 MiB (v5e default is only 16 MiB) and capped at
    # 64 MiB (v7x physical VMEM).
    vmem_need = (2 * w_tile_k * tn * w_itemsize          # weight double buffer
                 + 2 * B_pad * d_pad * f_itemsize        # resident feats
                 + 2 * B_pad * tn * f_itemsize           # output double buffer
                 + 2 * 8 * tn * 4                        # bias tile (padded)
                 + B_pad * tn * 4)                       # accumulator scratch
    vmem_limit = int(min(max(2 * vmem_need, 32 << 20), 64 << 20))

    out = pl.pallas_call(
        kernel,
        out_shape=jax.ShapeDtypeStruct((B_pad, n_pad), feats.dtype),
        grid_spec=pltpu.PrefetchScalarGridSpec(
            num_scalar_prefetch=0,
            grid=grid,
            in_specs=in_specs,
            out_specs=out_specs,
            scratch_shapes=scratch_shapes,
        ),
        compiler_params=pltpu.CompilerParams(
            dimension_semantics=dim_sem,
            vmem_limit_bytes=vmem_limit,
        ),
        cost_estimate=cost,
    )(feats_in, w_cat, b_cat)

    # Glue: split columns per modality and reshape to (-1, *obs_shapes[k]).
    outputs = OrderedDict()
    off = 0
    for k, d in zip(meta["keys"], meta["out_dims"]):
        outputs[k] = out[:B, off:off + d].reshape((-1,) + tuple(obs_shapes[k]))
        off += d
    return outputs


# --------------------------------------------------------------------------
# Parameter init (mimics nn.Linear default: uniform +-1/sqrt(fan_in))
# --------------------------------------------------------------------------
def init_decoder_params(key, input_feat_dim, obs_shapes, dtype=jnp.float32):
    weights = OrderedDict()
    biases = OrderedDict()
    bound = 1.0 / np.sqrt(input_feat_dim)
    for k in obs_shapes:
        out_dim = int(np.prod(obs_shapes[k]))
        key, kw, kb = jax.random.split(key, 3)
        # PyTorch Linear stores weight as [out, in]; we store transposed
        # [in, out] so the kernel computes feats @ W (== feats @ W_pt.T).
        weights[k] = jax.random.uniform(
            kw, (input_feat_dim, out_dim), dtype=dtype, minval=-bound, maxval=bound
        )
        biases[k] = jax.random.uniform(
            kb, (out_dim,), dtype=dtype, minval=-bound, maxval=bound
        )
    return weights, biases


def _check(outputs, feats, weights, biases, obs_shapes, atol=1e-4, rtol=1e-4):
    ok = True
    B = feats.shape[0]
    for k in obs_shapes:
        expect_shape = (B,) + tuple(obs_shapes[k])
        if outputs[k].shape != expect_shape:
            ok = False
            continue
        ref = (np.asarray(feats) @ np.asarray(weights[k])
               + np.asarray(biases[k])).reshape(expect_shape)
        if not np.allclose(np.asarray(outputs[k]), ref, atol=atol, rtol=rtol):
            ok = False
    return ok


if __name__ == "__main__":
    key = jax.random.PRNGKey(0)

    # ---- Test 1: typical ObservationDecoder (small D -> single-K fast path) ----
    B = 2
    input_feat_dim = 32
    obs_shapes = OrderedDict(
        [
            ("action", (7,)),
            ("low_dim", (3, 4)),
            ("image_feat", (2, 8, 8)),
        ]
    )

    key, kf = jax.random.split(key)
    feats = jax.random.normal(kf, (B, input_feat_dim), dtype=jnp.float32)
    weights, biases = init_decoder_params(key, input_feat_dim, obs_shapes)

    w_cat, b_cat, meta = prepare_decoder_params(weights, biases, obs_shapes,
                                                param_dtype=jnp.float32)
    w_cat = jax.block_until_ready(w_cat)
    b_cat = jax.block_until_ready(b_cat)

    outputs = observation_decoder_forward(feats, w_cat, b_cat, obs_shapes, meta)
    outputs = jax.block_until_ready(outputs)
    ok = _check(outputs, feats, weights, biases, obs_shapes)

    # ---- Test 2: force the accumulating (K-tiled) path with small tiles ----
    input_feat_dim2 = 256
    obs_shapes2 = OrderedDict([("recon", (16, 16))])
    key, kf2 = jax.random.split(key)
    feats2 = jax.random.normal(kf2, (B, input_feat_dim2), dtype=jnp.float32)
    weights2, biases2 = init_decoder_params(key, input_feat_dim2, obs_shapes2)
    w_cat2, b_cat2, meta2 = prepare_decoder_params(
        weights2, biases2, obs_shapes2, tn=128, tk=128, param_dtype=jnp.float32
    )
    outputs2 = observation_decoder_forward(feats2, w_cat2, b_cat2, obs_shapes2, meta2)
    outputs2 = jax.block_until_ready(outputs2)
    ok = ok and _check(outputs2, feats2, weights2, biases2, obs_shapes2)

    print("KERNEL_OK" if ok else "KERNEL_MISMATCH")
</pallas_src>

<mosaic_0001>
module attributes {stable_mosaic.version = 11 : i64} {
  func.func @_decoder_kernel_single(%arg0: i32, %arg1: memref<8x128xf32, #tpu.memory_space<vmem>>, %arg2: memref<128x128xf32, #tpu.memory_space<vmem>>, %arg3: memref<1x128xf32, #tpu.memory_space<vmem>>, %arg4: memref<8x128xf32, #tpu.memory_space<vmem>>) attributes {dimension_semantics = [#tpu.dimension_semantics<parallel>], iteration_bounds = array<i64: 2>, scalar_prefetch = 0 : i64, scratch_operands = 0 : i64, tpu.core_type = #tpu.core_type<tc>, window_params = [{pipeline_mode = #tpu.pipeline_mode<synchronous>, transform_indices = @transform_0, window_bounds = array<i64: 8, 128>}, {transform_indices = @transform_1, window_bounds = array<i64: 128, 128>}, {transform_indices = @transform_2, window_bounds = array<i64: 1, 128>}, {transform_indices = @transform_3, window_bounds = array<i64: 8, 128>}]} {
    %c0 = arith.constant 0 : index
    %c0_0 = arith.constant 0 : index
    %0 = vector.load %arg1[%c0, %c0_0] : memref<8x128xf32, #tpu.memory_space<vmem>>, vector<8x128xf32>
    %c0_1 = arith.constant 0 : index
    %c0_2 = arith.constant 0 : index
    %1 = vector.load %arg2[%c0_1, %c0_2] : memref<128x128xf32, #tpu.memory_space<vmem>>, vector<128x128xf32>
    %cst = arith.constant dense<0.000000e+00> : vector<8x128xf32>
    %2 = tpu.matmul %0, %1, %cst {dimension_numbers = #tpu.dot_dimension_numbers<[1], [0], [0], [1], [0, 0, 1, 1], [], []>} : vector<8x128xf32>, vector<128x128xf32>, vector<8x128xf32> -> vector<8x128xf32>
    %c0_3 = arith.constant 0 : index
    %c0_4 = arith.constant 0 : index
    %3 = vector.load %arg3[%c0_3, %c0_4] : memref<1x128xf32, #tpu.memory_space<vmem>>, vector<1x128xf32>
    %4 = vector.broadcast %3 : vector<1x128xf32> to vector<8x128xf32>
    %5 = arith.addf %2, %4 : vector<8x128xf32>
    %c0_5 = arith.constant 0 : index
    %c0_6 = arith.constant 0 : index
    %6 = vector.load %arg4[%c0_5, %c0_6] : memref<8x128xf32, #tpu.memory_space<vmem>>, vector<8x128xf32>
    tpu.vector_store %arg4[%c0_5, %c0_6], %5 {strides = array<i32>} : memref<8x128xf32, #tpu.memory_space<vmem>>, vector<8x128xf32>,
    return
  }
  func.func @transform_0(%arg0: i32) -> (i32, i32) {
    %c0_i32 = arith.constant 0 : i32
    %c0_i32_0 = arith.constant 0 : i32
    %c0_i32_1 = arith.constant 0 : i32
    return %c0_i32, %c0_i32_0 : i32, i32
  }
  func.func @transform_1(%arg0: i32) -> (i32, i32) {
    %c0_i32 = arith.constant 0 : i32
    %c0_i32_0 = arith.constant 0 : i32
    return %c0_i32, %arg0 : i32, i32
  }
  func.func @transform_2(%arg0: i32) -> (i32, i32) {
    %c0_i32 = arith.constant 0 : i32
    %c0_i32_0 = arith.constant 0 : i32
    return %c0_i32, %arg0 : i32, i32
  }
  func.func @transform_3(%arg0: i32) -> (i32, i32) {
    %c0_i32 = arith.constant 0 : i32
    %c0_i32_0 = arith.constant 0 : i32
    return %c0_i32, %arg0 : i32, i32
  }
}

</mosaic_0001>

<bundles_post_ra>
// kernel: tpu_custom_call.1
= control target key start
LH: loop header
LB: loop body
LE: loop exit
PB: predicated region body
PF: predicated region fallthrough
CT: control target
= control target key end

     0   :  { %8 = vsyncpa [#allocation3], 0  ;;  %s948_s0 = inlined_call_operand.hbm [shape: f32[8,128], index: 0, kind: input, shape index: {}]   ;;  %s949_s1 = inlined_call_operand.hbm [shape: f32[128,256], index: 1, kind: input, shape index: {}]   ;;  %s950_s2 = inlined_call_operand.vmem [shape: f32[1,256], index: 2, kind: input, shape index: {}]   ;;  %s951_s3 = inlined_call_operand.hbm [shape: f32[8,256], index: 3, kind: output, shape index: {}]  }
   0x1   :  { %9 = vsyncpa [#allocation6], 0 }
   0x2   :  { %11 = vsyncpa [#allocation6 + $0x1], 0 }
   0x3   :  { %12 = vsyncpa [#allocation4], 0 }
   0x4   :  { %14 = vsyncpa [#allocation4 + $0x1], 0  ;;  %s728_s12 = smov 0   ;;  %s730_s13 = smov 0  }
   0x5   :  { %s732_s14 = smov 0   ;;  %s734_s15 = smov 0  }
   0x6 LB: > { %s749_s16 = sadd.s32 4294967295, %s697_s15   ;;  %s415_s17 = sadd.s32 4294967294, %s697_s15   ;;  %s697_s15 = sphi %s734_s15, %s976_s15   ;;  %s693_s14 = sphi %s732_s14, %s975_s14   ;;  %s689_s13 = sphi %s730_s13, %s974_s13   ;;  %s685_s12 = sphi %s728_s12, %s973_s12  }
   0x7   : > { %s753_s18 = sadd.s32 1, %s697_s15   ;;  %s48_s19 = sadd.s32 1, %s693_s14 }
   0x8   : > { %s45_s20 = ssub.s32 %s697_s15, %s753_s18  ;;  %p55_p0 = scmp.ne.s32.totalorder %s693_s14, %s689_s13 }
   0x9   : > { %p46_p1 = scmp.eq.s32.totalorder %s45_s20, 0  ;;  %p56_p2 = scmp.eq.s32.totalorder %s697_s15, 0 }
   0xa   : > { %p61_p3 = scmp.ne.s32.totalorder %s689_s13, %s685_s12  ;;  %p952_p4 = scmp.eq.s32.totalorder %s749_s16, 0 }
   0xb   : > { %s765_s21 = scalar_select %p46_p1, %s693_s14, %s48_s19  }
   0xc   : > { %p767_p5 = por %p56_p2, %p55_p0  ;;  %p773_p6 = por %p952_p4, %p61_p3 }
   0xd   : > { %p111_p7 = scmp.eq.s32.totalorder %s749_s16, 1  ;;  %p117_p8 = scmp.eq.s32.totalorder %s415_s17, 1 }
   0xe   : > { %s958_s23 = scalar_select %p773_p6, 1, 0 }
   0xf   : > { %p416_p9 = scmp.ge.s32.totalorder %s697_s15, 1  ;;  %p124_p10 = scmp.lt.s32.totalorder %s697_s15, 3 }
  0x10   : > { %p780_p11 = por %p111_p7, %p55_p0  ;;  %p784_p12 = por %p117_p8, %p61_p3 }
  0x11   : > { %p788_p13 = pnand %p416_p9, %p124_p10  ;;  %s699_s27 = smov [#allocation2]  }
  0x12   : > { %s959_s24 = scalar_select %p780_p11, 1, 0 }
  0x13   : > { %s960_s25 = scalar_select %p784_p12, 1, 0 }
  0x14   : > { %s961_s26 = scalar_select %p788_p13, 1, 0 }
  0x15   : > { %p514_p2 = pneg %p788_p13  ;;  %s137_s28 = sshll.u32 %s699_s27, 4  ;;  %s138_s28 = int_to_ptr.vmem [resolvable:$true] %s137_s28 }
  0x16   : > { %p527_p4 = scmp.lt.s32.totalorder %s697_s15, 2  ;;  %p962_p0 = scmp.eq.s32.totalorder %s749_s16, 0 }
  0x17   : > { %s148_s30 = sand.u32 1, %s693_s14   ;;  %s569_s8 = scalar_lea.hbm %s948_s0, 128 }
  0x18   : > { %p798_p7 = pnand %p514_p2, %p962_p0  ;;  %p805_p3 = pnand %p527_p4, %p767_p5 }
  0x19   : > { %s419_s5 = sshll.u32 %s148_s30, 7  ;;  %p570_p8 = scmp.ne.s32.totalorder %s948_s0, %s569_s8 }
  0x1a   : > { %s964_s4 = scalar_select %p805_p3, 1, 0 }
  0x1b   : > { %p571_p9 = pneg %p798_p7  ;;  %p576_p4 = scmp.lt.u32.totalorder %s569_s8, %s948_s0 }
  0x1d   : > { %p572_p10 = pnand %p571_p9, %p570_p8 }
  0x1f   : > { %p573_p2 = pneg %p572_p10 }
  0x21   : > { %p578_p5 = pnand %p576_p4, %p573_p2 }
  0x23   : > { %581 = shalt.err (!%p578_p5)
}
  0x24   : > { %s582_s19 = scalar_lea.vmem %s138_s28, 128  ;;  %p590_p11 = scmp.lt.s32.totalorder %s138_s28, %s138_s28 }
  0x25   : > { %p583_p0 = scmp.ne.s32.totalorder %s138_s28, %s582_s19  ;;  %p591_p6 = scmp.lt.s32.totalorder %s582_s19, %s582_s19 }
  0x27   : > { %p585_p1 = pnand %p583_p0, %p571_p9  ;;  %p592_p13 = por %p591_p6, %p590_p11 }
  0x29   : > { %p586_p12 = pneg %p585_p1 }
  0x2b   : > { %p593_p3 = pnand %p592_p13, %p586_p12 }
  0x2d   : > { %596 = shalt.err (!%p593_p3)
}
  0x2e   : > { %517 = dma.hbm_to_vmem [thread:$0]  (!%p798_p7), %s948_s0, 128, %s138_s28, [#allocation3]  }
  0x2f   : > { %s420_s27 = sshll.u32 %s697_s15, 7  ;;  %s152_s6 = scalar_lea.vmem [#allocation5], %s419_s5 }
  0x30   : > { %s158_s7 = sshll.u32 %s152_s6, 4  ;;  %s829_s10 = scalar_lea.hbm %s949_s1, %s420_s27  ;;  %s831_s7 = int_to_ptr.vmem [resolvable:$true] %s158_s7 }
  0x31   : > { %s833_s29 = scalar_lea.sflag [#allocation6], %s148_s30  ;;  %s597_s11 = scalar_lea.hbm %s829_s10, 2048 }
  0x32   : > { %p598_p6 = scmp.ne.s32.totalorder %s829_s10, %s597_s11  ;;  %p965_p11 = scmp.ne.s32.totalorder %s964_s4, 0 }
  0x33   : > { %s602_s17 = scalar_lea.hbm %s949_s1, 4096  ;;  %p603_p7 = scmp.lt.u32.totalorder %s829_s10, %s949_s1 }
  0x34   : > { %p599_p12 = pneg %p965_p11  ;;  %p604_p3 = scmp.lt.u32.totalorder %s602_s17, %s597_s11 }
  0x35   : > { %p606_p9 = scmp.lt.u32.totalorder %s597_s11, %s829_s10 }
  0x36   : > { %p600_p13 = pnand %p599_p12, %p598_p6  ;;  %p605_p8 = por %p604_p3, %p603_p7 }
  0x38   : > { %p601_p1 = pneg %p600_p13  ;;  %p607_p10 = por %p606_p9, %p605_p8 }
  0x3a   : > { %p608_p2 = pnand %p607_p10, %p601_p1 }
  0x3c   : > { %611 = shalt.err (!%p608_p2)
}
  0x3d   : > { %s612_s30 = scalar_lea.vmem %s831_s7, 2048  ;;  %s700_s22 = smov [#allocation5]  }
  0x3e   : > { %p613_p4 = scmp.ne.s32.totalorder %s831_s7, %s612_s30  ;;  %s617_s27 = sshll.u32 %s700_s22, 4  ;;  %s618_s27 = int_to_ptr.vmem [resolvable:$false] %s617_s27 }
  0x3f   : > { %s619_s6 = scalar_lea.vmem %s618_s27, 4096  ;;  %p620_p6 = scmp.lt.s32.totalorder %s831_s7, %s618_s27 }
  0x40   : > { %p615_p5 = pnand %p613_p4, %p599_p12  ;;  %p621_p13 = scmp.lt.s32.totalorder %s619_s6, %s612_s30 }
  0x42   : > { %p616_p0 = pneg %p615_p5  ;;  %p622_p7 = por %p621_p13, %p620_p6 }
  0x44   : > { %p623_p3 = pnand %p622_p7, %p616_p0 }
  0x46   : > { %626 = shalt.err (!%p623_p3)
}
  0x47   : > { %s701_s8 = smov 256   ;;  %s702_s9 = smov 128  }
  0x48   : > { %s703_s11 = smov 8   ;;  %p966_p12 = scmp.ne.s32.totalorder %s961_s26, 0 }
  0x49   : > { %521 = dma.hbm_to_vmem [thread:$0]  (!%p965_p11), %s829_s10, 2048, %s831_s7, %s833_s29, %s701_s8, %s702_s9, %s703_s11  }
  0x4a   : > { %176 = sbr.rel (%p966_p12) target bundleno = 348 (0x15c), region = 32  ;;  %p967_p1 = scmp.eq.s32.totalorder (!%p966_p12), %s749_s16, 0 }
  0x51   : > { %672 = dma.done.wait (%p967_p1), [#allocation3], 128   ;;  %p968_p8 = pmov %p967_p1 }
  0x52   : > { %s868_s28 = sand.u32 1, %s689_s13   ;;  %p969_p11 = scmp.ne.s32.totalorder %s958_s23, 0 }
  0x53   : > { %674 = vsyncadd (%p968_p8), [#allocation3], 4294967168  ;;  %s423_s5 = sshll.u32 %s868_s28, 7  ;;  %s183_s17 = scalar_lea.sflag [#allocation6], %s868_s28 }
  0x54   : > { %s872_s19 = scalar_lea.vmem [#allocation5], %s423_s5 }
  0x55   : > { %676 = dma.done.wait (%p969_p11), %s183_s17, 2048  }
  0x56   : > { %678 = vsyncadd (%p969_p11), %s183_s17, 4294965248  ;;  %v704_v0 = vmov 0.0|0.0   ;;  %vm705_vm0 = vmmov 0   ;;  %v706_v1 = vmov 0.0   ;;  %v216_v2 = vld [vmem:[%s872_s19] sm:$0xff]  ;;  %v217_v3 = vld [vmem:[%s872_s19 + $0x8] sm:$0xff] }
  0x57   : > { %482 = vmatprep.subr.bf16.mxu0 %v704_v0  ;;  %479 = vmatprep.mubr.msk.f32.mxu0 %vm705_vm0, %v706_v1  ;;  %v218_v4 = vld [vmem:[%s872_s19 + $0x10] sm:$0xff]  ;;  %v483_v5 = vpack.c.bf16 %v217_v3, %v216_v2  ;;  %v219_v6 = vld [vmem:[%s872_s19 + $0x18] sm:$0xff]  ;;  %v220_v8 = vld [vmem:[%s872_s19 + $0x20] sm:$0xff]  ;;  %p212_p9 = scmp.lt.s32.totalorder %s749_s16, 1  ;;  %s424_s26 = sshll.u32 %s868_s28, 3 }
  0x58   : > { %v486_v7 = vpack.c.bf16 %v219_v6, %v218_v4  ;;  %v221_v9 = vld [vmem:[%s872_s19 + $0x28] sm:$0xff]  ;;  %v222_v11 = vld [vmem:[%s872_s19 + $0x30] sm:$0xff]  ;;  %v223_v12 = vld [vmem:[%s872_s19 + $0x38] sm:$0xff]  ;;  %s427_s29 = sshll.u32 %s749_s16, 7  ;;  %s211_s20 = scalar_lea.vmem [#allocation7], %s424_s26 }
  0x59   : > { %484 = vmatpush3.bf16.msra.mxu0 %v483_v5  ;;  %v489_v10 = vpack.c.bf16 %v221_v9, %v220_v8  ;;  %v492_v13 = vpack.c.bf16 %v223_v12, %v222_v11  ;;  %v224_v14 = vld [vmem:[%s872_s19 + $0x40] sm:$0xff]  ;;  %v225_v15 = vld [vmem:[%s872_s19 + $0x48] sm:$0xff]  ;;  %v226_v17 = vld [vmem:[%s872_s19 + $0x50] sm:$0xff]  ;;  %s213_s23 = scalar_select %p212_p9, %s749_s16, 1 }
  0x5a   : > { %485 = vmatprep.subr.bf16.mxu0 %v704_v0  ;;  %v495_v16 = vpack.c.bf16 %v225_v15, %v224_v14  ;;  %v227_v18 = vld [vmem:[%s872_s19 + $0x58] sm:$0xff]  ;;  %v228_v20 = vld [vmem:[%s872_s19 + $0x60] sm:$0xff]  ;;  %v229_v21 = vld [vmem:[%s872_s19 + $0x68] sm:$0xff]  ;;  %s324_s30 = sshll.u32 %s211_s20, 4  ;;  %s904_s6 = scalar_lea.hbm %s951_s3, %s427_s29  ;;  %s906_s30 = int_to_ptr.vmem [resolvable:$true] %s324_s30 }
  0x5b   : > { %v498_v19 = vpack.c.bf16 %v227_v18, %v226_v17  ;;  %v501_v22 = vpack.c.bf16 %v229_v21, %v228_v20  ;;  %v230_v23 = vld [vmem:[%s872_s19 + $0x70] sm:$0xff]  ;;  %v231_v24 = vld [vmem:[%s872_s19 + $0x78] sm:$0xff]  ;;  %s214_s10 = scalar_lea.vmem %s950_s2, %s213_s23  ;;  %s311_s8 = scalar_lea.sflag [#allocation4], %s868_s28 }
  0x5c   : > { %v504_v25 = vpack.c.bf16 %v231_v24, %v230_v23  ;;  %v215_v26 = vld [vmem:[#allocation2] sm:$0xff]  ;;  %s627_s9 = scalar_lea.vmem %s906_s30, 128  ;;  %p970_p2 = scmp.ne.s32.totalorder %s959_s24, 0 }
  0x5d   : > { %487 = vmatpush3.bf16.msra.mxu0 %v486_v7  ;;  %v425_v27 = vld [vmem:[%s214_s10] ss:$0 sm:$0xff]  ;;  %p628_p10 = scmp.ne.s32.totalorder %s906_s30, %s627_s9  ;;  %s707_s16 = smov [#allocation7]  }
  0x5e   : > { %488 = vmatprep.subr.bf16.mxu0 %v704_v0  ;;  %s631_s11 = sshll.u32 %s707_s16, 4  ;;  %s632_s11 = int_to_ptr.vmem [resolvable:$false] %s631_s11 }
  0x5f   : > { %p629_p4 = pnand %p628_p10, %p970_p2  ;;  %s633_s5 = scalar_lea.vmem %s632_s11, 256 }
  0x60   : > { %p634_p0 = scmp.lt.s32.totalorder %s906_s30, %s632_s11  ;;  %p635_p6 = scmp.lt.s32.totalorder %s633_s5, %s627_s9 }
  0x61   : > { %490 = vmatpush3.bf16.msra.mxu0 %v489_v10  ;;  %p630_p5 = pneg %p629_p4 }
  0x62   : > { %491 = vmatprep.subr.bf16.mxu0 %v704_v0  ;;  %p636_p13 = por %p635_p6, %p634_p0 }
  0x64   : > { %p637_p7 = pnand %p636_p13, %p630_p5 }
  0x65   : > { %493 = vmatpush3.bf16.msra.mxu0 %v492_v13 }
  0x66   : > { %494 = vmatprep.subr.bf16.mxu0 %v704_v0 }
  0x69   : > { %496 = vmatpush3.bf16.msra.mxu0 %v495_v16 }
  0x6a   : > { %497 = vmatprep.subr.bf16.mxu0 %v704_v0 }
  0x6d   : > { %499 = vmatpush3.bf16.msra.mxu0 %v498_v19 }
  0x6e   : > { %500 = vmatprep.subr.bf16.mxu0 %v704_v0 }
  0x71   : > { %502 = vmatpush3.bf16.msra.mxu0 %v501_v22 }
  0x72   : > { %503 = vmatprep.subr.bf16.mxu0 %v704_v0 }
  0x75   : > { %505 = vmatpush3.bf16.msra.mxu0 %v504_v25 }
  0x78   : > { %480 = vmatmul.mubr.f32.vlgmr.msra.gmra.mrb[0].mxu0 %v215_v26 }
 0x14b   : > { %v305_v28 = vpop.f32.mrb[0].mxu0 }
 0x14c   : > { %v306_v29 = vadd.f32 %v425_v27, %v305_v28  ;;  %v481_v30 = vpop.f32.mrb[1].mxu0 }
 0x14e   : > { %309 = vst [vmem:[%s211_s20] sm:$0xff] %v306_v29 }
 0x14f   : > { %640 = shalt.err (!%p637_p7)
}
 0x150   : > { %s641_s28 = scalar_lea.hbm %s904_s6, 128  ;;  %s645_s23 = scalar_lea.hbm %s951_s3, 256 }
 0x151   : > { %p642_p3 = scmp.ne.s32.totalorder %s904_s6, %s641_s28  ;;  %p646_p8 = scmp.lt.u32.totalorder %s904_s6, %s951_s3 }
 0x152   : > { %p647_p11 = scmp.lt.u32.totalorder %s645_s23, %s641_s28  ;;  %p649_p10 = scmp.lt.u32.totalorder %s641_s28, %s904_s6 }
 0x153   : > { %p643_p12 = pnand %p642_p3, %p970_p2 }
 0x154   : > { %p648_p9 = por %p647_p11, %p646_p8 }
 0x155   : > { %p644_p1 = pneg %p643_p12 }
 0x156   : > { %p650_p4 = por %p649_p10, %p648_p9 }
 0x158   : > { %p651_p5 = pnand %p650_p4, %p644_p1 }
 0x15a   : > { %654 = shalt.err (!%p651_p5)
}
 0x15b   : > { %512 = dma.vmem_to_hbm [thread:$0]  (%p970_p2), %s906_s30, 128, %s904_s6, %s311_s8  }
 0x15c PF: > { %s336_s7 = sand.u32 1, %s685_s12   ;;  %p971_p0 = scmp.ne.s32.totalorder %s960_s25, 0 }
 0x15d   : > { %p972_p6 = scmp.ge.s32.totalorder %s697_s15, 2  ;;  %s337_s10 = scalar_lea.sflag [#allocation4], %s336_s7 }
 0x15f   : > { %p523_p13 = pnand %p972_p6, %p971_p0 }
 0x161   : > { %680 = dma.done.wait (!%p523_p13), %s337_s10, 128  }
 0x162   : > { %682 = vsyncadd (!%p523_p13), %s337_s10, 4294967168  ;;  %p17_p7 = scmp.ge.s32.totalorder %s753_s18, 4   ;;  %s973_s12 = smov %s689_s13 }
 0x163   : > { %s974_s13 = smov %s693_s14  ;;  %s975_s14 = smov %s765_s21 }
 0x164   : > { %s976_s15 = smov %s753_s18  ;;  %19 = sbr.rel (!%p17_p7) target bundleno = 6 (0x6), region = 85 }
 0x16b   :  { %342 = vsyncpa [#allocation3], 1 }
 0x16c   :  { %344 = vsyncpa [#allocation3 + $0x1], 1 }
 0x16d   :  { %345 = vsyncpa [#allocation6], 1 }
 0x16e   :  { %347 = vsyncpa [#allocation6 + $0x1], 1 }
 0x16f   :  { %348 = vsyncpa [#allocation4], 1 }
 0x170   :  { %350 = vsyncpa [#allocation4 + $0x1], 1 }

</bundles_post_ra>
